<compile_context>
chip_gen: v7x
topology: tpu7x:2x2x1
jax: 0.10.0
libtpu: 0.0.40
codegen_flags: <defaults>
</compile_context>

<pallas_src>
import functools

import jax
import jax.numpy as jnp
import numpy as np
from jax.experimental import pallas as pl
from jax.experimental.pallas import tpu as pltpu


def _round_up(x, m):
    return ((x + m - 1) // m) * m


def _user_encoder_kernel(x_ref, len_ref, w_ref, b_ref, q_ref, out_ref, *, use_mask):
    # x_ref   : VMEM f32   [Bt, N, D]   (tile of batch elements)
    # len_ref : VMEM int32 [Bt, 1]
    # w_ref   : VMEM f32   [D, Q]
    # b_ref   : VMEM f32   [1, Q]
    # q_ref   : VMEM f32   [1, Q]
    # out_ref : VMEM f32   [Bt, D]
    x = x_ref[...]                                                   # [Bt, N, D]
    bt, n, d = x.shape
    qdim = w_ref.shape[1]

    # Additive-attention projection: fold the batch tile into the MXU M dimension.
    x2 = x.reshape(bt * n, d)                                        # [Bt*N, D]
    h = jnp.tanh(
        jnp.dot(x2, w_ref[...], preferred_element_type=jnp.float32) + b_ref[...]
    )                                                                # [Bt*N, Q]
    h3 = h.reshape(bt, n, qdim)                                      # [Bt, N, Q]

    # Attention logits via VPU multiply + lane reduction (avoid a 1-lane MXU pass).
    q_row = q_ref[...].reshape(1, 1, qdim)
    scores = jnp.sum(h3 * q_row, axis=-1)                            # [Bt, N]

    if use_mask:
        pos = jax.lax.broadcasted_iota(jnp.int32, (bt, n), 1)        # [Bt, N]
        scores = jnp.where(pos < len_ref[...], scores, jnp.float32(-1e9))

    # Softmax over the clicked-news axis, operating on lane-dense [Bt, N] tiles.
    m = jnp.max(scores, axis=1, keepdims=True)                       # [Bt, 1]
    e = jnp.exp(scores - m)                                          # [Bt, N]
    denom = jnp.sum(e, axis=1, keepdims=True)                        # [Bt, 1]

    # Unnormalized weighted sum; divide folded into the output store (EUP vrcp).
    acc = jnp.sum(e[:, :, None] * x, axis=1)                         # [Bt, D]
    out_ref[...] = acc * pl.reciprocal(denom, approx=True)


def _choose_block_batch(B, N, D):
    """Pick a batch-tile size: big enough to amortize per-step overhead, small enough
    that double-buffered tiles are far below the v7x/v5e VMEM budgets."""
    b8 = _round_up(B, 8)
    target_tile_bytes = 2 * 1024 * 1024          # double-buffered -> ~4 MiB of VMEM
    bt = max(8, (target_tile_bytes // (N * D * 4)) // 8 * 8)
    bt = min(bt, 1024, b8)
    # Keep at least 2 grid steps when there is enough work (v7x has 2 TensorCores).
    if b8 >= 16 and _round_up(B, bt) // bt < 2:
        bt = _round_up(b8 // 2, 8)
    return bt


def user_encoder(clicked_news_vector, clicked_news_length, W, b, q, *,
                 use_mask=True, block_batch=None):
    """clicked_news_vector: [B, N, D] f32; clicked_news_length: [B] int32."""
    x = jnp.asarray(clicked_news_vector, jnp.float32)
    lengths = jnp.asarray(clicked_news_length, jnp.int32)
    B, N, D = x.shape
    Q = W.shape[1]

    bt = block_batch if block_batch is not None else _choose_block_batch(B, N, D)
    b_pad = _round_up(B, bt)
    grid = b_pad // bt

    if b_pad != B:
        x = jnp.pad(x, ((0, b_pad - B), (0, 0), (0, 0)))
        lengths = jnp.pad(lengths, (0, b_pad - B))
    lengths2d = lengths.reshape(b_pad, 1)
    w_mat = jnp.asarray(W, jnp.float32)
    b_row = jnp.asarray(b, jnp.float32).reshape(1, Q)
    q_row = jnp.asarray(q, jnp.float32).reshape(1, Q)

    # Explicit scoped-VMEM budget (v5e defaults to 16 MiB scoped; v7x has 64 MiB total).
    est = 2 * (bt * N * D * 4 + bt * 4 + bt * D * 4) + 2 * (D * Q + 2 * Q) * 4
    vmem_limit = int(min(max(4 * est, 16 * 1024 * 1024), 48 * 1024 * 1024))

    kernel = functools.partial(_user_encoder_kernel, use_mask=use_mask)

    out = pl.pallas_call(
        kernel,
        out_shape=jax.ShapeDtypeStruct((b_pad, D), jnp.float32),
        grid=(grid,),
        in_specs=[
            pl.BlockSpec((bt, N, D), lambda i: (i, 0, 0)),
            pl.BlockSpec((bt, 1), lambda i: (i, 0)),
            pl.BlockSpec((D, Q), lambda i: (0, 0)),
            pl.BlockSpec((1, Q), lambda i: (0, 0)),
            pl.BlockSpec((1, Q), lambda i: (0, 0)),
        ],
        out_specs=pl.BlockSpec((bt, D), lambda i: (i, 0)),
        compiler_params=pltpu.CompilerParams(
            dimension_semantics=("parallel",),
            vmem_limit_bytes=vmem_limit,
        ),
    )(x, lengths2d, w_mat, b_row, q_row)

    return out[:B]


def user_encoder_ref(x, lengths, W, b, q, *, use_mask=True):
    h = jnp.tanh(jnp.einsum("bnd,dq->bnq", x, W) + b.reshape(1, 1, -1))
    scores = jnp.einsum("bnq,q->bn", h, q.reshape(-1))
    if use_mask:
        pos = jnp.arange(x.shape[1])[None, :]
        scores = jnp.where(pos < lengths[:, None], scores, -1e9)
    w = jax.nn.softmax(scores, axis=1)
    return jnp.einsum("bn,bnd->bd", w, x)


if __name__ == "__main__":
    # Small config: batch=2, num_clicked_news=8, word_embedding_dim=32, query_vector_dim=16
    B, N, D, Q = 2, 8, 32, 16

    key = jax.random.PRNGKey(0)
    k_x, k_w, k_b, k_q, k_x2, k_l2 = jax.random.split(key, 6)

    clicked_news_vector = jax.random.normal(k_x, (B, N, D), dtype=jnp.float32)
    clicked_news_length = jnp.array([5, 8], dtype=jnp.int32)

    # AdditiveAttention params: Linear(D, Q) + query vector of dim Q.
    W = jax.random.uniform(k_w, (D, Q), dtype=jnp.float32, minval=-0.1, maxval=0.1)
    b = jax.random.uniform(k_b, (1, Q), dtype=jnp.float32, minval=-0.1, maxval=0.1)
    q = jax.random.uniform(k_q, (Q, 1), dtype=jnp.float32, minval=-0.1, maxval=0.1)

    out = user_encoder(clicked_news_vector, clicked_news_length, W, b, q, use_mask=True)
    out = jax.block_until_ready(out)
    ref = user_encoder_ref(clicked_news_vector, clicked_news_length, W, b, q, use_mask=True)
    # approx=True reciprocal (EUP vrcp) -> slightly looser tolerance than exact divide.
    np.testing.assert_allclose(np.asarray(out), np.asarray(ref), rtol=2e-3, atol=2e-3)

    # Second check: larger batch exercising batch padding and a multi-step grid.
    B2 = 20
    x2 = jax.random.normal(k_x2, (B2, N, D), dtype=jnp.float32)
    len2 = jax.random.randint(k_l2, (B2,), 1, N + 1, dtype=jnp.int32)
    out2 = jax.block_until_ready(user_encoder(x2, len2, W, b, q, use_mask=True))
    ref2 = user_encoder_ref(x2, len2, W, b, q, use_mask=True)
    np.testing.assert_allclose(np.asarray(out2), np.asarray(ref2), rtol=2e-3, atol=2e-3)

    print("KERNEL_OK")
</pallas_src>

<mosaic_0001>
module attributes {stable_mosaic.version = 11 : i64} {
  func.func @_user_encoder_kernel(%arg0: i32, %arg1: memref<8x8x32xf32, #tpu.memory_space<vmem>>, %arg2: memref<8x1xi32, #tpu.memory_space<vmem>>, %arg3: memref<32x16xf32, #tpu.memory_space<vmem>>, %arg4: memref<1x16xf32, #tpu.memory_space<vmem>>, %arg5: memref<1x16xf32, #tpu.memory_space<vmem>>, %arg6: memref<8x32xf32, #tpu.memory_space<vmem>>) attributes {dimension_semantics = [#tpu.dimension_semantics<parallel>], iteration_bounds = array<i64: 1>, scalar_prefetch = 0 : i64, scratch_operands = 0 : i64, tpu.core_type = #tpu.core_type<tc>, window_params = [{transform_indices = @transform_0, window_bounds = array<i64: 8, 8, 32>}, {transform_indices = @transform_1, window_bounds = array<i64: 8, 1>}, {pipeline_mode = #tpu.pipeline_mode<synchronous>, transform_indices = @transform_2, window_bounds = array<i64: 32, 16>}, {pipeline_mode = #tpu.pipeline_mode<synchronous>, transform_indices = @transform_3, window_bounds = array<i64: 1, 16>}, {pipeline_mode = #tpu.pipeline_mode<synchronous>, transform_indices = @transform_4, window_bounds = array<i64: 1, 16>}, {transform_indices = @transform_5, window_bounds = array<i64: 8, 32>}]} {
    %c0 = arith.constant 0 : index
    %c0_0 = arith.constant 0 : index
    %c0_1 = arith.constant 0 : index
    %0 = vector.load %arg1[%c0, %c0_0, %c0_1] : memref<8x8x32xf32, #tpu.memory_space<vmem>>, vector<8x8x32xf32>
    %1 = vector.shape_cast %0 : vector<8x8x32xf32> to vector<64x32xf32>
    %c0_2 = arith.constant 0 : index
    %c0_3 = arith.constant 0 : index
    %2 = vector.load %arg3[%c0_2, %c0_3] : memref<32x16xf32, #tpu.memory_space<vmem>>, vector<32x16xf32>
    %cst = arith.constant dense<0.000000e+00> : vector<64x16xf32>
    %3 = tpu.matmul %1, %2, %cst {dimension_numbers = #tpu.dot_dimension_numbers<[1], [0], [0], [1], [0, 0, 1, 1], [], []>} : vector<64x32xf32>, vector<32x16xf32>, vector<64x16xf32> -> vector<64x16xf32>
    %c0_4 = arith.constant 0 : index
    %c0_5 = arith.constant 0 : index
    %4 = vector.load %arg4[%c0_4, %c0_5] : memref<1x16xf32, #tpu.memory_space<vmem>>, vector<1x16xf32>
    %5 = vector.broadcast %4 : vector<1x16xf32> to vector<64x16xf32>
    %6 = arith.addf %3, %5 : vector<64x16xf32>
    %7 = math.tanh %6 : vector<64x16xf32>
    %8 = vector.shape_cast %7 : vector<64x16xf32> to vector<8x8x16xf32>
    %c0_6 = arith.constant 0 : index
    %c0_7 = arith.constant 0 : index
    %9 = vector.load %arg5[%c0_6, %c0_7] : memref<1x16xf32, #tpu.memory_space<vmem>>, vector<1x16xf32>
    %10 = vector.shape_cast %9 : vector<1x16xf32> to vector<1x1x16xf32>
    %11 = vector.broadcast %10 : vector<1x1x16xf32> to vector<8x8x16xf32>
    %12 = arith.mulf %8, %11 : vector<8x8x16xf32>
    %cst_8 = arith.constant dense<0.000000e+00> : vector<8x8xf32>
    %13 = vector.multi_reduction <add>, %12, %cst_8 [2] : vector<8x8x16xf32> to vector<8x8xf32>
    %14 = tpu.iota {dimensions = array<i32: 1>} : vector<8x8xi32>
    %c0_9 = arith.constant 0 : index
    %c0_10 = arith.constant 0 : index
    %15 = vector.load %arg2[%c0_9, %c0_10] : memref<8x1xi32, #tpu.memory_space<vmem>>, vector<8x1xi32>
    %16 = vector.broadcast %15 : vector<8x1xi32> to vector<8x8xi32>
    %17 = arith.cmpi slt, %14, %16 : vector<8x8xi32>
    %cst_11 = arith.constant -1.000000e+09 : f32
    %18 = vector.broadcast %cst_11 : f32 to vector<8x8xf32>
    %19 = arith.select %17, %13, %18 : vector<8x8xi1>, vector<8x8xf32>
    %cst_12 = arith.constant dense<0xFF800000> : vector<8xf32>
    %20 = vector.multi_reduction <maximumf>, %19, %cst_12 [1] : vector<8x8xf32> to vector<8xf32>
    %21 = vector.shape_cast %20 : vector<8xf32> to vector<8x1xf32>
    %22 = vector.broadcast %21 : vector<8x1xf32> to vector<8x8xf32>
    %23 = arith.subf %19, %22 : vector<8x8xf32>
    %24 = math.exp %23 : vector<8x8xf32>
    %cst_13 = arith.constant dense<0.000000e+00> : vector<8xf32>
    %25 = vector.multi_reduction <add>, %24, %cst_13 [1] : vector<8x8xf32> to vector<8xf32>
    %26 = vector.shape_cast %25 : vector<8xf32> to vector<8x1xf32>
    %27 = vector.shape_cast %24 : vector<8x8xf32> to vector<8x8x1xf32>
    %28 = vector.broadcast %27 : vector<8x8x1xf32> to vector<8x8x32xf32>
    %29 = arith.mulf %28, %0 : vector<8x8x32xf32>
    %cst_14 = arith.constant dense<0.000000e+00> : vector<8x32xf32>
    %30 = vector.multi_reduction <add>, %29, %cst_14 [1] : vector<8x8x32xf32> to vector<8x32xf32>
    %31 = tpu.reciprocal %26 {approx = true} : vector<8x1xf32> -> vector<8x1xf32>
    %32 = vector.broadcast %31 : vector<8x1xf32> to vector<8x32xf32>
    %33 = arith.mulf %30, %32 : vector<8x32xf32>
    %c0_15 = arith.constant 0 : index
    %c0_16 = arith.constant 0 : index
    %34 = vector.load %arg6[%c0_15, %c0_16] : memref<8x32xf32, #tpu.memory_space<vmem>>, vector<8x32xf32>
    tpu.vector_store %arg6[%c0_15, %c0_16], %33 {strides = array<i32>} : memref<8x32xf32, #tpu.memory_space<vmem>>, vector<8x32xf32>,
    return
  }
  func.func @transform_0(%arg0: i32) -> (i32, i32, i32) {
    %c0_i32 = arith.constant 0 : i32
    %c0_i32_0 = arith.constant 0 : i32
    %c0_i32_1 = arith.constant 0 : i32
    return %arg0, %c0_i32, %c0_i32_0 : i32, i32, i32
  }
  func.func @transform_1(%arg0: i32) -> (i32, i32) {
    %c0_i32 = arith.constant 0 : i32
    %c0_i32_0 = arith.constant 0 : i32
    return %arg0, %c0_i32 : i32, i32
  }
  func.func @transform_2(%arg0: i32) -> (i32, i32) {
    %c0_i32 = arith.constant 0 : i32
    %c0_i32_0 = arith.constant 0 : i32
    %c0_i32_1 = arith.constant 0 : i32
    return %c0_i32, %c0_i32_0 : i32, i32
  }
  func.func @transform_3(%arg0: i32) -> (i32, i32) {
    %c0_i32 = arith.constant 0 : i32
    %c0_i32_0 = arith.constant 0 : i32
    %c0_i32_1 = arith.constant 0 : i32
    return %c0_i32, %c0_i32_0 : i32, i32
  }
  func.func @transform_4(%arg0: i32) -> (i32, i32) {
    %c0_i32 = arith.constant 0 : i32
    %c0_i32_0 = arith.constant 0 : i32
    %c0_i32_1 = arith.constant 0 : i32
    return %c0_i32, %c0_i32_0 : i32, i32
  }
  func.func @transform_5(%arg0: i32) -> (i32, i32) {
    %c0_i32 = arith.constant 0 : i32
    %c0_i32_0 = arith.constant 0 : i32
    return %arg0, %c0_i32 : i32, i32
  }
}

</mosaic_0001>

<bundles_post_ra>
// kernel: tpu_custom_call.1
= control target key start
LH: loop header
LB: loop body
LE: loop exit
PB: predicated region body
PF: predicated region fallthrough
CT: control target
= control target key end

     0   :  { %10 = vsyncpa [#allocation3], 0  ;;  %s779_s0 = inlined_call_operand.hbm [shape: f32[8,8,32], index: 0, kind: input, shape index: {}]   ;;  %s780_s1 = inlined_call_operand.vmem [shape: s32[8,1], index: 1, kind: input, shape index: {}]   ;;  %s781_s2 = inlined_call_operand.vmem [shape: f32[32,16], index: 2, kind: input, shape index: {}]   ;;  %s782_s3 = inlined_call_operand.vmem [shape: f32[1,16], index: 3, kind: input, shape index: {}]   ;;  %s783_s4 = inlined_call_operand.vmem [shape: f32[1,16], index: 4, kind: input, shape index: {}]   ;;  %s784_s5 = inlined_call_operand.hbm [shape: f32[8,32], index: 5, kind: output, shape index: {}]  }
   0x1   :  { %11 = vsyncpa [#allocation4], 0  ;;  %s617_s18 = smov [#allocation2]   ;;  %s569_s22 = scalar_lea.hbm %s779_s0, 1024 }
   0x2   :  { %s17_s19 = sshll.u32 %s617_s18, 4  ;;  %p570_p0 = scmp.ne.s32.totalorder %s779_s0, %s569_s22  ;;  %s18_s19 = int_to_ptr.vmem [resolvable:$true] %s17_s19 }
   0x3   :  { %p573_p1 = scmp.lt.u32.totalorder %s569_s22, %s779_s0 }
   0x5   :  { %p575_p2 = pnand %p573_p1, %p570_p0 }
   0x7   :  { %578 = shalt.err (!%p575_p2)
}
   0x8   :  { %s579_s27 = scalar_lea.vmem %s18_s19, 1024  ;;  %p584_p4 = scmp.lt.s32.totalorder %s18_s19, %s18_s19 }
   0x9   :  { %p580_p3 = scmp.ne.s32.totalorder %s18_s19, %s579_s27  ;;  %p585_p5 = scmp.lt.s32.totalorder %s579_s27, %s579_s27 }
   0xb   :  { %p586_p6 = por %p585_p5, %p584_p4 }
   0xd   :  { %p587_p7 = pnand %p586_p6, %p580_p3 }
   0xf   :  { %590 = shalt.err (!%p587_p7)
}
  0x10   :  { %s618_s28 = smov 128   ;;  %s619_s29 = smov 8  }
  0x11   :  { %23 = dma.hbm_to_vmem [thread:$0]  %s779_s0, 1024, %s18_s19, [#allocation3], %s618_s28, %s618_s28, %s619_s29  }
  0x12   :  { %613 = dma.done.wait [#allocation3], 1024  }
  0x13   :  { %614 = vsyncadd [#allocation3], 4294966272  ;;  %vm54_vm0 = vcmask 261120   ;;  %v43_v0 = vld [vmem:[%s781_s2] sm:$0xff]  ;;  %v44_v1 = vld [vmem:[%s781_s2 + $0x8] sm:$0xff]  ;;  %v620_v14 = vmov 0   ;;  %v232_v58 = vlaneseq }
  0x14   :  { %v45_v2 = vld [vmem:[%s781_s2 + $0x10] sm:$0xff]  ;;  %v531_v3 = vpack.c.bf16 %v44_v1, %v43_v0  ;;  %v46_v4 = vld [vmem:[%s781_s2 + $0x18] sm:$0xff]  ;;  %v676_v5 = vld [vmem:[#allocation2] sm:$0xff]  ;;  %548 = vset.pattern.permute.xlu0 %v620_v14  ;;  %vm207_vm1 = vcmask 130048   ;;  %vm279_vm2 = vcmask 1041409   ;;  %vm281_vm3 = vcmask 1042434  }
  0x15   :  { %v535_v6 = vpack.c.bf16 %v46_v4, %v45_v2  ;;  %519 = vmatprep.mubr.msk.f32.mxu0 %vm54_vm0, %v676_v5  ;;  %v680_v7 = vld [vmem:[#allocation2 + $0x20] sm:$0xff]  ;;  %v684_v8 = vld [vmem:[#allocation2 + $0x8] sm:$0xff]  ;;  %v688_v10 = vld [vmem:[#allocation2 + $0x10] sm:$0xff]  ;;  %v233_v59 = vand.u32 127, %v232_v58  ;;  %v725_v60 = vshrl.u32 %v232_v58, 7  ;;  %vm283_vm4 = vcmask 1043459  }
  0x16   :  { %532 = vmatprep.subr.bf16.mxu0 %v531_v3  ;;  %539 = vmatprep.subr.bf16.mxu1 %v531_v3  ;;  %v686_v9 = vld [vmem:[#allocation2 + $0x28] sm:$0xff]  ;;  %v690_v11 = vld [vmem:[#allocation2 + $0x30] sm:$0xff]  ;;  %v698_v12 = vld [vmem:[#allocation2 + $0x18] sm:$0xff]  ;;  %vm285_vm5 = vcmask 1044484   ;;  %vm287_vm6 = vcmask 1045509   ;;  %vm289_vm7 = vcmask 1046534  }
  0x17   :  { %534 = vmatpush3.bf16.msra.mxu0 %v531_v3  ;;  %541 = vmatpush3.bf16.msra.mxu1 %v531_v3  ;;  %v702_v13 = vld [vmem:[#allocation2 + $0x38] sm:$0xff]  ;;  %v489_v15 = vld [vmem:[%s782_s3] ss:$0 sm:$0xff]  ;;  %v249_v62 = vsub.s32 %v233_v59, %v725_v60  ;;  %vm291_vm8 = vcmask 1047559   ;;  %vm295_vm9 = vcmask 64512  }
  0x18   :  { %536 = vmatprep.subr.bf16.mxu0 %v535_v6  ;;  %540 = vmatprep.subr.bf16.mxu1 %v535_v6  ;;  %v498_v32 = vld [vmem:[%s783_s4] ss:$0 sm:$0xff] }
  0x19   :  { %525 = vmatprep.mubr.msk.f32.mxu1 %vm54_vm0, %v680_v7  ;;  %v234_v57 = vld [vmem:[%s780_s1] sm:$0xff]  ;;  %s621_s1 = smov [#allocation5]  }
  0x1a   :  { %s480_s17 = sshll.u32 %s621_s1, 4  ;;  %s481_s17 = int_to_ptr.vmem [resolvable:$true] %s480_s17 }
  0x1b   :  { %538 = vmatpush3.bf16.msra.mxu0 %v535_v6  ;;  %542 = vmatpush3.bf16.msra.mxu1 %v535_v6  ;;  %s591_s18 = scalar_lea.vmem %s481_s17, 128  ;;  %p596_p9 = scmp.lt.s32.totalorder %s481_s17, %s481_s17 }
  0x1c   :  { %p592_p8 = scmp.ne.s32.totalorder %s481_s17, %s591_s18  ;;  %p597_p10 = scmp.lt.s32.totalorder %s591_s18, %s591_s18 }
  0x1e   :  { %520 = vmatmul.mubr.msk.f32.vlgmr.msra.gmra.mrb[0].mxu0 %vm54_vm0, %v684_v8  ;;  %526 = vmatmul.mubr.msk.f32.vlgmr.msra.gmra.mrb[0].mxu1 %vm54_vm0, %v686_v9  ;;  %p598_p11 = por %p597_p10, %p596_p9 }
  0x1f   :  { %522 = vmatprep.mubr.msk.f32.mxu0 %vm54_vm0, %v688_v10  ;;  %528 = vmatprep.mubr.msk.f32.mxu1 %vm54_vm0, %v690_v11 }
  0x20   :  { %p599_p12 = pnand %p598_p11, %p592_p8 }
  0x22   :  { %523 = vmatmul.mubr.msk.f32.gmra.mrb[2].mxu0 %vm54_vm0, %v698_v12  ;;  %529 = vmatmul.mubr.msk.f32.gmra.mrb[2].mxu1 %vm54_vm0, %v702_v13 }
  0xf1   :  { %v521_v16 = vpop.f32.mrb[0].mxu0  ;;  %v527_v17 = vpop.f32.mrb[0].mxu1 }
  0xf2   :  { %v151_v18 = vadd.f32 %v521_v16, %v489_v15  ;;  %v145_v19 = vpop.f32.mrb[1].mxu0  ;;  %v165_v20 = vpop.f32.mrb[1].mxu1  ;;  %v171_v30 = vadd.f32 %v527_v17, %v489_v15 }
  0xf3   :  { %v146_v21 = vadd.f32 %v489_v15, %v145_v19  ;;  %v166_v22 = vadd.f32 %v489_v15, %v165_v20 }
  0xf4   :  { %549 = vtanh.f32 %v151_v18 }
  0xf5   :  { %551 = vtanh.f32 %v146_v21  ;;  %v524_v23 = vpop.f32.mrb[2].mxu0  ;;  %v530_v24 = vpop.f32.mrb[2].mxu1 }
  0xf6   :  { %v161_v25 = vadd.f32 %v524_v23, %v489_v15  ;;  %v155_v26 = vpop.f32.mrb[3].mxu0  ;;  %v175_v27 = vpop.f32.mrb[3].mxu1  ;;  %553 = vtanh.f32 %v166_v22  ;;  %v181_v31 = vadd.f32 %v530_v24, %v489_v15 }
  0xf7   :  { %v156_v28 = vadd.f32 %v489_v15, %v155_v26  ;;  %v176_v29 = vadd.f32 %v489_v15, %v175_v27 }
  0xf8   :  { %555 = vtanh.f32 %v161_v25 }
  0xf9   :  { %557 = vtanh.f32 %v156_v28 }
  0xfa   :  { %559 = vtanh.f32 %v176_v29 }
  0xfb   :  { %561 = vtanh.f32 %v171_v30 }
  0xfc   :  { %563 = vtanh.f32 %v181_v31 }
  0xfe   :  { %v550_v33 = vpop.eup %549 }
  0xff   :  { %v552_v34 = vpop.eup %551  ;;  %v200_v35 = vmul.f32 %v550_v33, %v498_v32 }
 0x100   :  { %v554_v36 = vpop.eup %553  ;;  %v199_v38 = vmul.f32 %v552_v34, %v498_v32 }
 0x101   :  { %v211_v37 = vsel %vm207_vm1, %v200_v35, 0.0  ;;  %v203_v42 = vmul.f32 %v554_v36, %v498_v32  ;;  %v349_v35 = vsub.s32 6, %v725_v60 }
 0x102   :  { %v556_v39 = vpop.eup %555  ;;  %212 = vadd.xlane.f32.xlu0 %v211_v37  ;;  %v208_v45 = vsel %vm207_vm1, %v199_v38, 0.0 }
 0x103   :  { %v558_v40 = vpop.eup %557  ;;  %v202_v41 = vmul.f32 %v556_v39, %v498_v32  ;;  %v220_v48 = vsel %vm207_vm1, %v203_v42, 0.0  ;;  %v314_v39 = vsub.s32 1, %v725_v60 }
 0x104   :  { %v560_v43 = vpop.eup %559  ;;  %v201_v46 = vmul.f32 %v558_v40, %v498_v32 }
 0x105   :  { %v217_v44 = vsel %vm207_vm1, %v202_v41, 0.0  ;;  %v562_v47 = vpop.eup %561  ;;  %v205_v49 = vmul.f32 %v560_v43, %v498_v32  ;;  %v321_v41 = vsub.s32 2, %v725_v60  ;;  %v307_v43 = vsub.s32 0, %v725_v60 }
 0x106   :  { %218 = vadd.xlane.f32.xlu1 %v217_v44  ;;  %209 = vadd.xlane.f32.xlu0 %v208_v45  ;;  %v214_v50 = vsel %vm207_vm1, %v201_v46, 0.0  ;;  %v204_v51 = vmul.f32 %v562_v47, %v498_v32  ;;  %v564_v52 = vpop.eup %563  ;;  %v328_v45 = vsub.s32 3, %v725_v60  ;;  %v335_v47 = vsub.s32 4, %v725_v60 }
 0x107   :  { %v226_v53 = vsel %vm207_vm1, %v205_v49, 0.0  ;;  %v206_v55 = vmul.f32 %v564_v52, %v498_v32  ;;  %v342_v49 = vsub.s32 5, %v725_v60 }
 0x108   :  { %v223_v54 = vsel %vm207_vm1, %v204_v51, 0.0  ;;  %v356_v51 = vsub.s32 7, %v725_v60 }
 0x109   :  { %v229_v56 = vsel %vm207_vm1, %v206_v55, 0.0 }
 0x10a   :  { %215 = vadd.xlane.f32.xlu1 %v214_v50  ;;  %221 = vadd.xlane.f32.xlu0 %v220_v48 }
 0x10e   :  { %224 = vadd.xlane.f32.xlu1 %v223_v54  ;;  %227 = vadd.xlane.f32.xlu0 %v226_v53 }
 0x112   :  { %230 = vadd.xlane.f32.xlu1 %v229_v56 }
 0x124   :  { %236 = vperm.xlu0 %548, %v234_v57  }
 0x18f   :  { %v213_v61 = vpop.xlane.xlu0 %212 }
 0x190   :  { %v254_v2 = vrot.slane %v213_v61, %v249_v62 }
 0x193   :  { %v219_v63 = vpop.xlane.xlu1 %218  ;;  %v210_v0 = vpop.xlane.xlu0 %209 }
 0x194   :  { %v250_v1 = vrot.slane %v210_v0, %v249_v62  ;;  %v262_v14 = vrot.slane %v219_v63, %v249_v62 }
 0x196   :  { %v280_v15 = vsel %vm279_vm2, %v254_v2, %v250_v1 }
 0x197   :  { %v216_v3 = vpop.xlane.xlu1 %215  ;;  %v222_v4 = vpop.xlane.xlu0 %221 }
 0x198   :  { %v258_v6 = vrot.slane %v216_v3, %v249_v62  ;;  %v266_v18 = vrot.slane %v222_v4, %v249_v62 }
 0x19a   :  { %v282_v16 = vsel %vm281_vm3, %v258_v6, %v280_v15 }
 0x19b   :  { %v284_v17 = vsel %vm283_vm4, %v262_v14, %v282_v16  ;;  %v225_v19 = vpop.xlane.xlu1 %224  ;;  %v228_v21 = vpop.xlane.xlu0 %227 }
 0x19c   :  { %v270_v20 = vrot.slane %v225_v19, %v249_v62  ;;  %v286_v22 = vsel %vm285_vm5, %v266_v18, %v284_v17  ;;  %v274_v23 = vrot.slane %v228_v21, %v249_v62 }
 0x19e   :  { %v288_v25 = vsel %vm287_vm6, %v270_v20, %v286_v22 }
 0x19f   :  { %v231_v24 = vpop.xlane.xlu1 %230  ;;  %v290_v28 = vsel %vm289_vm7, %v274_v23, %v288_v25 }
 0x1a0   :  { %v278_v26 = vrot.slane %v231_v24, %v249_v62 }
 0x1a2   :  { %v292_v29 = vsel %vm291_vm8, %v278_v26, %v290_v28 }
 0x1a3   :  { %v237_v27 = vpop.permute.xlu0 %236 }
 0x1a4   :  { %vm238_vm10 = vcmp.lt.s32.totalorder %v233_v59, %v237_v27 }
 0x1a5   :  { %v294_v30 = vsel %vm238_vm10, %v292_v29, -1e+09 }
 0x1a6   :  { %v296_v31 = vsel %vm295_vm9, %v294_v30, -inf }
 0x1a7   :  { %297 = vmax.xlane.f32.xlu1 %v296_v31 }
 0x234   :  { %v298_v32 = vpop.xlane.xlu1 %297 }
 0x235   :  { %v299_v33 = vsub.f32 %v294_v30, %v298_v32 }
 0x237   :  { %v300_v34 = vmul.f32 1.442695, %v299_v33 }
 0x239   :  { %565 = vpow2.f32 %v300_v34 }
 0x243   :  { %v566_v36 = vpop.eup %565 }
 0x244   :  { %v302_v37 = vsel %vm295_vm9, %v566_v36, 0.0  ;;  %v350_v38 = vrot.slane %v566_v36, %v349_v35  ;;  %v315_v40 = vrot.slane %v566_v36, %v314_v39  ;;  %v322_v42 = vrot.slane %v566_v36, %v321_v41 }
 0x245   :  { %303 = vadd.xlane.f32.xlu1 %v302_v37  ;;  %v308_v44 = vrot.slane %v566_v36, %v307_v43  ;;  %v329_v46 = vrot.slane %v566_v36, %v328_v45  ;;  %v336_v48 = vrot.slane %v566_v36, %v335_v47  ;;  %v343_v50 = vrot.slane %v566_v36, %v342_v49 }
 0x246   :  { %352 = vbcast.lane.b32.xlu0 %v350_v38, 256  ;;  %v357_v52 = vrot.slane %v566_v36, %v356_v51 }
 0x256   :  { %317 = vbcast.lane.b32.xlu1 %v315_v40, 256 }
 0x25a   :  { %324 = vbcast.lane.b32.xlu1 %v322_v42, 256 }
 0x25e   :  { %310 = vbcast.lane.b32.xlu1 %v308_v44, 256 }
 0x262   :  { %331 = vbcast.lane.b32.xlu1 %v329_v46, 256 }
 0x266   :  { %338 = vbcast.lane.b32.xlu1 %v336_v48, 256 }
 0x26a   :  { %345 = vbcast.lane.b32.xlu1 %v343_v50, 256 }
 0x26e   :  { %359 = vbcast.lane.b32.xlu1 %v357_v52, 256 }
 0x2b8   :  { %v353_v59 = vpop.permute.xlu0 %352 }
 0x2b9   :  { %v367_v63 = vmul.f32 %v353_v59, %v690_v11 }
 0x2d2   :  { %v304_v53 = vpop.xlane.xlu1 %303 }
 0x2d3   :  { %567 = vrcp.f32 %v304_v53 }
 0x2d6   :  { %v318_v54 = vpop.permute.xlu1 %317 }
 0x2d7   :  { %v362_v55 = vmul.f32 %v318_v54, %v684_v8  ;;  %v411_v8 = vsel %vm54_vm0, %v367_v63, 0.0 }
 0x2d8   :  { %v412_v17 = vrot.slane %v411_v8, 4 }
 0x2d9   :  { %v376_v56 = vsel %vm54_vm0, %v362_v55, 0.0 }
 0x2da   :  { %v377_v57 = vrot.slane %v376_v56, 4  ;;  %v325_v58 = vpop.permute.xlu1 %324  ;;  %v413_v25 = vadd.f32 %v412_v17, %v411_v8 }
 0x2db   :  { %v363_v61 = vmul.f32 %v325_v58, %v688_v10 }
 0x2dc   :  { %v378_v0 = vadd.f32 %v377_v57, %v376_v56  ;;  %v414_v36 = vrot.slane %v413_v25, 2 }
 0x2dd   :  { %v383_v62 = vsel %vm54_vm0, %v363_v61, 0.0  ;;  %v568_v35 = vpop.eup %567 }
 0x2de   :  { %v384_v60 = vrot.slane %v383_v62, 4  ;;  %v311_v1 = vpop.permute.xlu1 %310  ;;  %v379_v6 = vrot.slane %v378_v0, 2  ;;  %v427_v45 = vrot.slane %v568_v35, 1  ;;  %v429_v50 = vrot.slane %v568_v35, 3 }
 0x2df   :  { %v361_v2 = vmul.f32 %v311_v1, %v676_v5  ;;  %v428_v56 = vrot.slane %v568_v35, 2  ;;  %v430_v58 = vrot.slane %v568_v35, 4  ;;  %v432_v8 = vrot.slane %v568_v35, 6 }
 0x2e0   :  { %v385_v3 = vadd.f32 %v384_v60, %v383_v62  ;;  %v380_v19 = vadd.f32 %v379_v6, %v378_v0 }
 0x2e1   :  { %v369_v4 = vsel %vm54_vm0, %v361_v2, 0.0 }
 0x2e2   :  { %v370_v14 = vrot.slane %v369_v4, 4  ;;  %v332_v15 = vpop.permute.xlu1 %331  ;;  %v386_v18 = vrot.slane %v385_v3, 2  ;;  %v381_v28 = vrot.slane %v380_v19, 1 }
 0x2e3   :  { %v364_v10 = vmul.f32 %v332_v15, %v698_v12 }
 0x2e4   :  { %v371_v16 = vadd.f32 %v370_v14, %v369_v4  ;;  %v387_v26 = vadd.f32 %v386_v18, %v385_v3  ;;  %v382_v38 = vadd.f32 %v381_v28, %v380_v19  ;;  %v431_v4 = vrot.slane %v568_v35, 5 }
 0x2e5   :  { %v390_v11 = vsel %vm54_vm0, %v364_v10, 0.0 }
 0x2e6   :  { %v372_v20 = vrot.slane %v371_v16, 2  ;;  %v391_v21 = vrot.slane %v390_v11, 4  ;;  %v339_v5 = vpop.permute.xlu1 %338  ;;  %v388_v37 = vrot.slane %v387_v26, 1  ;;  %v443_v52 = vmul.f32 %v427_v45, %v382_v38 }
 0x2e7   :  { %v365_v22 = vmul.f32 %v339_v5, %v680_v7 }
 0x2e8   :  { %v373_v23 = vadd.f32 %v372_v20, %v371_v16  ;;  %v392_v24 = vadd.f32 %v391_v21, %v390_v11  ;;  %v389_v49 = vadd.f32 %v388_v37, %v387_v26  ;;  %v458_v60 = vrot.slane %v443_v52, 7 }
 0x2e9   :  { %v397_v27 = vsel %vm54_vm0, %v365_v22, 0.0 }
 0x2ea   :  { %v393_v29 = vrot.slane %v392_v24, 2  ;;  %v398_v12 = vrot.slane %v397_v27, 4  ;;  %v346_v30 = vpop.permute.xlu1 %345  ;;  %v374_v31 = vrot.slane %v373_v23, 1  ;;  %v444_v0 = vmul.f32 %v428_v56, %v389_v49 }
 0x2eb   :  { %v366_v32 = vmul.f32 %v346_v30, %v686_v9  ;;  %v415_v9 = vadd.f32 %v414_v36, %v413_v25 }
 0x2ec   :  { %v394_v33 = vadd.f32 %v393_v29, %v392_v24  ;;  %v399_v34 = vadd.f32 %v398_v12, %v397_v27  ;;  %v375_v43 = vadd.f32 %v374_v31, %v373_v23  ;;  %v460_v17 = vrot.slane %v444_v0, 6 }
 0x2ed   :  { %v404_v7 = vsel %vm54_vm0, %v366_v32, 0.0  ;;  %v416_v63 = vrot.slane %v415_v9, 1  ;;  %v433_v23 = vrot.slane %v568_v35, 7 }
 0x2ee   :  { %v395_v39 = vrot.slane %v394_v33, 1  ;;  %v400_v40 = vrot.slane %v399_v34, 2  ;;  %v405_v41 = vrot.slane %v404_v7, 4  ;;  %v360_v42 = vpop.permute.xlu1 %359  ;;  %v442_v57 = vmul.f32 %v568_v35, %v375_v43 }
 0x2ef   :  { %v368_v44 = vmul.f32 %v360_v42, %v702_v13  ;;  %v417_v16 = vadd.f32 %v416_v63, %v415_v9 }
 0x2f0   :  { %v396_v46 = vadd.f32 %v395_v39, %v394_v33  ;;  %v401_v47 = vadd.f32 %v400_v40, %v399_v34  ;;  %v406_v48 = vadd.f32 %v405_v41, %v404_v7  ;;  %v459_v6 = vsel %vm279_vm2, %v458_v60, %v442_v57 }
 0x2f1   :  { %v418_v51 = vsel %vm54_vm0, %v368_v44, 0.0  ;;  %v448_v20 = vmul.f32 %v432_v8, %v417_v16  ;;  %v461_v21 = vsel %vm281_vm3, %v460_v17, %v459_v6 }
 0x2f2   :  { %v402_v53 = vrot.slane %v401_v47, 1  ;;  %v407_v54 = vrot.slane %v406_v48, 2  ;;  %v419_v55 = vrot.slane %v418_v51, 4  ;;  %v445_v59 = vmul.f32 %v429_v50, %v396_v46 }
 0x2f3   :  { %v468_v28 = vrot.slane %v448_v20, 2 }
 0x2f4   :  { %v403_v61 = vadd.f32 %v402_v53, %v401_v47  ;;  %v408_v62 = vadd.f32 %v407_v54, %v406_v48  ;;  %v420_v13 = vadd.f32 %v419_v55, %v418_v51  ;;  %v462_v14 = vrot.slane %v445_v59, 5 }
 0x2f6   :  { %v446_v1 = vmul.f32 %v430_v58, %v403_v61  ;;  %v409_v2 = vrot.slane %v408_v62, 1  ;;  %v421_v3 = vrot.slane %v420_v13, 2  ;;  %v463_v24 = vsel %vm283_vm4, %v462_v14, %v461_v21 }
 0x2f8   :  { %v410_v15 = vadd.f32 %v409_v2, %v408_v62  ;;  %v422_v10 = vadd.f32 %v421_v3, %v420_v13  ;;  %v464_v18 = vrot.slane %v446_v1, 4 }
 0x2fa   :  { %v447_v11 = vmul.f32 %v431_v4, %v410_v15  ;;  %v423_v19 = vrot.slane %v422_v10, 1  ;;  %v465_v25 = vsel %vm285_vm5, %v464_v18, %v463_v24 }
 0x2fc   :  { %v466_v5 = vrot.slane %v447_v11, 3  ;;  %v424_v22 = vadd.f32 %v423_v19, %v422_v10 }
 0x2fe   :  { %v449_v26 = vmul.f32 %v433_v23, %v424_v22  ;;  %v467_v27 = vsel %vm287_vm6, %v466_v5, %v465_v25 }
 0x2ff   :  { %v469_v12 = vsel %vm289_vm7, %v468_v28, %v467_v27 }
 0x300   :  { %v470_v29 = vrot.slane %v449_v26, 1 }
 0x302   :  { %v471_v30 = vsel %vm291_vm8, %v470_v29, %v469_v12 }
 0x303   :  { %473 = vst.msk [vmem:[#allocation5] sm:$0xff] %vm54_vm0, %v471_v30 }
 0x304   :  { %602 = shalt.err (!%p599_p12)
}
 0x305   :  { %s603_s21 = scalar_lea.hbm %s784_s5, 128 }
 0x306   :  { %p604_p13 = scmp.ne.s32.totalorder %s784_s5, %s603_s21  ;;  %p607_p0 = scmp.lt.u32.totalorder %s603_s21, %s784_s5 }
 0x308   :  { %p609_p1 = pnand %p607_p0, %p604_p13 }
 0x30a   :  { %612 = shalt.err (!%p609_p1)
}
 0x30b   :  { %483 = dma.vmem_to_hbm [thread:$0]  %s481_s17, 128, %s784_s5, [#allocation4]  }
 0x30c   :  { %615 = dma.done.wait [#allocation4], 128  }
 0x30d   :  { %616 = vsyncadd [#allocation4], 4294967168 }
 0x30e   :  { %487 = vsyncpa [#allocation3], 1 }
 0x30f   :  { %488 = vsyncpa [#allocation4], 1 }

</bundles_post_ra>
